<compile_context>
chip_gen: v7x
topology: tpu7x:2x2x1
jax: 0.10.0
libtpu: 0.0.40
codegen_flags: <defaults>
</compile_context>

<pallas_src>
import functools

import jax
import jax.numpy as jnp
from jax import lax
from jax.experimental import pallas as pl
from jax.experimental.pallas import tpu as pltpu

IMAGENET_DEFAULT_MEAN = jnp.array([0.485, 0.456, 0.406], dtype=jnp.float32)
IMAGENET_DEFAULT_STD = jnp.array([0.229, 0.224, 0.225], dtype=jnp.float32)


def _round_up(v, m):
    return -(-v // m) * m


def _project_kernel(p_ref, mn_ref, mx_ref, o_ref):
    """project(): per-channel clamp + 255-level quantization, done ONCE.

    p_ref : (C, pw, ph) VMEM  raw adv_patch (channel-first)
    mn_ref/mx_ref : (C, 1, 1) VMEM per-channel bounds
    o_ref : (C, pw, ph) VMEM  projected patch
    """
    p = p_ref[...]
    mn = mn_ref[...]
    mx = mx_ref[...]
    # NOTE: unguarded (mx - mn) division, matching the PyTorch reference
    # (never zero for the ImageNet normalization constants).
    p = jnp.maximum(jnp.minimum(p, mx), mn)
    q = jnp.floor((p - mn) / (mx - mn) * 255.0) / 255.0
    o_ref[...] = q * (mx - mn) + mn


def _apply_patch_kernel(p_ref, x_ref, o_ref, *, pw, ph, shift):
    """Read-modify-write of the patch band only (output aliases the input).

    p_ref : (1,  C, RB, CB) VMEM  projected patch embedded in a zero band
    x_ref : (BB, C, RB, CB) VMEM  band of BB images (aliased HBM buffer)
    o_ref : (BB, C, RB, CB) VMEM  same band of the output (same HBM buffer)
    """
    shape = x_ref.shape
    row = lax.broadcasted_iota(jnp.int32, shape, 2)
    col = lax.broadcasted_iota(jnp.int32, shape, 3)
    inside = ((row >= shift) & (row < shift + pw)
              & (col >= shift) & (col < shift + ph))
    # Single full-tile store: patch values inside the region, x outside.
    o_ref[...] = jnp.where(inside, p_ref[...], x_ref[...])


def patch_forward(x, adv_patch, min_v, max_v, patch_shift=0):
    """x: (B, C, W, H) f32 ; adv_patch: (pw, ph, C) f32 ; min_v/max_v: (C,) f32.

    Returns x with adv_patch (projected) written at
    [:, :, shift:shift+pw, shift:shift+ph].  The input x buffer is aliased to
    the output; only the patch band ever moves through HBM.
    """
    B, C, W, H = x.shape
    pw, ph, pc = adv_patch.shape
    assert pc == C, "adv_patch channel count must match x"
    # Bounds check (the in-kernel write has no runtime OOB protection).
    assert patch_shift + pw <= W and patch_shift + ph <= H, "patch out of bounds"

    # --- project() once, in a tiny Pallas kernel (hoisted out of the grid) ---
    patch_cfirst = jnp.transpose(adv_patch, (2, 0, 1)).astype(x.dtype)   # (C, pw, ph)
    mn = min_v.reshape(C, 1, 1).astype(x.dtype)
    mx = max_v.reshape(C, 1, 1).astype(x.dtype)
    projected = pl.pallas_call(
        _project_kernel,
        out_shape=jax.ShapeDtypeStruct((C, pw, ph), x.dtype),
    )(patch_cfirst, mn, mx)

    # --- patch-covering band, aligned to (8 sublanes, 128 lanes) ------------
    rb = _round_up(patch_shift + pw, 8)
    RB = W if rb >= W else rb                      # rows   [0, RB)
    cb = _round_up(patch_shift + ph, 128)
    CB = H if cb >= H else cb                      # cols   [0, CB)

    patch_band = jnp.zeros((1, C, RB, CB), x.dtype).at[
        0, :, patch_shift:patch_shift + pw, patch_shift:patch_shift + ph
    ].set(projected)

    # --- batch blocking: amortize per-grid-step overhead --------------------
    itemsize = jnp.dtype(x.dtype).itemsize
    band_bytes = C * RB * CB * itemsize
    # ~8 MiB budget for the double-buffered x-band input + output copies.
    cap = max(1, (8 << 20) // (4 * band_bytes))
    if B > 1:
        cap = min(cap, max(1, -(-B // 2)))         # keep >=2 steps for megacore
    BB = 1
    for d in range(min(B, cap), 0, -1):            # largest divisor of B <= cap
        if B % d == 0:
            BB = d
            break

    kernel = functools.partial(_apply_patch_kernel,
                               pw=pw, ph=ph, shift=patch_shift)

    # Output aliases x; the grid only visits the patch band, so every other
    # pixel of x is passed through without any HBM traffic.
    return pl.pallas_call(
        kernel,
        out_shape=jax.ShapeDtypeStruct((B, C, W, H), x.dtype),
        grid_spec=pltpu.PrefetchScalarGridSpec(
            num_scalar_prefetch=0,
            grid=(B // BB,),
            in_specs=[
                pl.BlockSpec((1, C, RB, CB), lambda b: (0, 0, 0, 0)),    # patch band
                pl.BlockSpec((BB, C, RB, CB), lambda b: (b, 0, 0, 0)),   # x band
            ],
            out_specs=pl.BlockSpec((BB, C, RB, CB), lambda b: (b, 0, 0, 0)),
        ),
        input_output_aliases={1: 0},   # x (input idx 1) aliases output 0
        compiler_params=pltpu.CompilerParams(
            dimension_semantics=("parallel",)),
    )(patch_band, x)


def patch_forward_ref(x, adv_patch, min_v, max_v, patch_shift=0):
    """Pure-JAX reference of the PyTorch forward (is_patch=True)."""
    pw, ph, C = adv_patch.shape
    B = x.shape[0]
    p = jnp.maximum(jnp.minimum(adv_patch, max_v), min_v)
    p = jnp.floor((p - min_v) / (max_v - min_v) * 255.0) / 255.0
    p = p * (max_v - min_v) + min_v
    patch = jnp.broadcast_to(jnp.transpose(p, (2, 0, 1))[None], (B, C, pw, ph))
    return x.at[:, :, patch_shift:patch_shift + pw,
                patch_shift:patch_shift + ph].set(patch)


if __name__ == "__main__":
    # Small, module-consistent shapes: B=2, C=3 (patch has 3 channels),
    # image 16x16, patch 8x8, is_patch=True, patch_shift=0.
    B, C, W, H = 2, 3, 16, 16
    pw, ph = 8, 8
    patch_shift = 0

    key = jax.random.PRNGKey(0)
    kx, kp = jax.random.split(key)
    x = jax.random.normal(kx, (B, C, W, H), dtype=jnp.float32)

    # nn.Parameter(torch.rand(w, h, 3) - 0.5)  (deterministic synthetic init)
    adv_patch = jax.random.uniform(kp, (pw, ph, C), dtype=jnp.float32) - 0.5

    # is_patch=True:  min = (0 - mean)/std ,  max = (1 - mean)/std   (per channel)
    min_v = (0.0 - IMAGENET_DEFAULT_MEAN) / IMAGENET_DEFAULT_STD
    max_v = (1.0 - IMAGENET_DEFAULT_MEAN) / IMAGENET_DEFAULT_STD

    # Reference is computed BEFORE the kernel call: the kernel aliases
    # (and may donate) x's buffer.
    ref = patch_forward_ref(x, adv_patch, min_v, max_v, patch_shift)
    ref = jax.block_until_ready(ref)

    out = patch_forward(x, adv_patch, min_v, max_v, patch_shift)
    out = jax.block_until_ready(out)

    assert out.shape == (B, C, W, H) and out.dtype == jnp.float32
    assert jnp.allclose(out, ref, atol=1e-6, rtol=1e-6), "mismatch vs reference"

    print("KERNEL_OK")
</pallas_src>

<mosaic_0001>
module attributes {stable_mosaic.version = 11 : i64} {
  func.func @_project_kernel(%arg0: memref<3x8x8xf32, #tpu.memory_space<vmem>>, %arg1: memref<3x1x1xf32, #tpu.memory_space<vmem>>, %arg2: memref<3x1x1xf32, #tpu.memory_space<vmem>>, %arg3: memref<3x8x8xf32, #tpu.memory_space<vmem>>) attributes {dimension_semantics = [], scalar_prefetch = 0 : i64, scratch_operands = 0 : i64, tpu.core_type = #tpu.core_type<tc>} {
    %c0 = arith.constant 0 : index
    %c0_0 = arith.constant 0 : index
    %c0_1 = arith.constant 0 : index
    %0 = vector.load %arg0[%c0, %c0_0, %c0_1] : memref<3x8x8xf32, #tpu.memory_space<vmem>>, vector<3x8x8xf32>
    %c0_2 = arith.constant 0 : index
    %c0_3 = arith.constant 0 : index
    %c0_4 = arith.constant 0 : index
    %1 = vector.load %arg1[%c0_2, %c0_3, %c0_4] : memref<3x1x1xf32, #tpu.memory_space<vmem>>, vector<3x1x1xf32>
    %c0_5 = arith.constant 0 : index
    %c0_6 = arith.constant 0 : index
    %c0_7 = arith.constant 0 : index
    %2 = vector.load %arg2[%c0_5, %c0_6, %c0_7] : memref<3x1x1xf32, #tpu.memory_space<vmem>>, vector<3x1x1xf32>
    %3 = vector.broadcast %2 : vector<3x1x1xf32> to vector<3x8x8xf32>
    %4 = arith.minimumf %0, %3 : vector<3x8x8xf32>
    %5 = vector.broadcast %1 : vector<3x1x1xf32> to vector<3x8x8xf32>
    %6 = arith.maximumf %4, %5 : vector<3x8x8xf32>
    %7 = vector.broadcast %1 : vector<3x1x1xf32> to vector<3x8x8xf32>
    %8 = arith.subf %6, %7 : vector<3x8x8xf32>
    %9 = arith.subf %2, %1 : vector<3x1x1xf32>
    %10 = vector.broadcast %9 : vector<3x1x1xf32> to vector<3x8x8xf32>
    %11 = arith.divf %8, %10 : vector<3x8x8xf32>
    %cst = arith.constant 2.550000e+02 : f32
    %12 = vector.broadcast %cst : f32 to vector<3x8x8xf32>
    %13 = arith.mulf %11, %12 : vector<3x8x8xf32>
    %14 = math.floor %13 : vector<3x8x8xf32>
    %cst_8 = arith.constant 2.550000e+02 : f32
    %15 = vector.broadcast %cst_8 : f32 to vector<3x8x8xf32>
    %16 = arith.divf %14, %15 : vector<3x8x8xf32>
    %17 = arith.subf %2, %1 : vector<3x1x1xf32>
    %18 = vector.broadcast %17 : vector<3x1x1xf32> to vector<3x8x8xf32>
    %19 = arith.mulf %16, %18 : vector<3x8x8xf32>
    %20 = vector.broadcast %1 : vector<3x1x1xf32> to vector<3x8x8xf32>
    %21 = arith.addf %19, %20 : vector<3x8x8xf32>
    %c0_9 = arith.constant 0 : index
    %c0_10 = arith.constant 0 : index
    %c0_11 = arith.constant 0 : index
    %22 = vector.load %arg3[%c0_9, %c0_10, %c0_11] : memref<3x8x8xf32, #tpu.memory_space<vmem>>, vector<3x8x8xf32>
    tpu.vector_store %arg3[%c0_9, %c0_10, %c0_11], %21 {strides = array<i32>} : memref<3x8x8xf32, #tpu.memory_space<vmem>>, vector<3x8x8xf32>,
    return
  }
}

</mosaic_0001>

<bundles_post_ra>
// kernel: tpu_custom_call.1
= control target key start
LH: loop header
LB: loop body
LE: loop exit
PB: predicated region body
PF: predicated region fallthrough
CT: control target
= control target key end

     0   :  { %8 = vsyncpa [#allocation3], 0  ;;  %s308_s0 = inlined_call_operand.hbm [shape: f32[3,8,8], index: 0, kind: input, shape index: {}]   ;;  %s309_s1 = inlined_call_operand.vmem [shape: f32[3,1,1], index: 1, kind: input, shape index: {}]   ;;  %s310_s2 = inlined_call_operand.vmem [shape: f32[3,1,1], index: 2, kind: input, shape index: {}]   ;;  %s311_s3 = inlined_call_operand.hbm [shape: f32[3,8,8], index: 3, kind: output, shape index: {}]  }
   0x1   :  { %9 = vsyncpa [#allocation4], 0  ;;  %s235_s12 = smov [#allocation2]   ;;  %s187_s16 = scalar_lea.hbm %s308_s0, 384 }
   0x2   :  { %s15_s13 = sshll.u32 %s235_s12, 4  ;;  %p188_p0 = scmp.ne.s32.totalorder %s308_s0, %s187_s16  ;;  %s16_s13 = int_to_ptr.vmem [resolvable:$true] %s15_s13 }
   0x3   :  { %p191_p1 = scmp.lt.u32.totalorder %s187_s16, %s308_s0 }
   0x5   :  { %p193_p2 = pnand %p191_p1, %p188_p0 }
   0x7   :  { %196 = shalt.err (!%p193_p2)
}
   0x8   :  { %s197_s21 = scalar_lea.vmem %s16_s13, 384  ;;  %p202_p4 = scmp.lt.s32.totalorder %s16_s13, %s16_s13 }
   0x9   :  { %p198_p3 = scmp.ne.s32.totalorder %s16_s13, %s197_s21  ;;  %p203_p5 = scmp.lt.s32.totalorder %s197_s21, %s197_s21 }
   0xb   :  { %p204_p6 = por %p203_p5, %p202_p4 }
   0xd   :  { %p205_p7 = pnand %p204_p6, %p198_p3 }
   0xf   :  { %208 = shalt.err (!%p205_p7)
}
  0x10   :  { %s236_s22 = smov 128   ;;  %s237_s23 = smov 8  }
  0x11   :  { %21 = dma.hbm_to_vmem [thread:$0]  %s308_s0, 384, %s16_s13, [#allocation3], %s236_s22, %s236_s22, %s237_s23  }
  0x12   :  { %231 = dma.done.wait [#allocation3], 384  }
  0x13   :  { %232 = vsyncadd [#allocation3], 4294966912  ;;  %v41_v0 = vlaneseq  ;;  %v238_v1 = vmov 0   ;;  %v36_v4 = vld [vmem:[%s310_s2 + $0x1] sm:$0x1]  ;;  %v30_v29 = vld [vmem:[#allocation2 + $0x8] sm:$0xff] }
  0x14   :  { %180 = vset.pattern.permute.xlu0 %v238_v1  ;;  %179 = vset.pattern.permute.xlu1 %v238_v1  ;;  %v33_v5 = vld [vmem:[%s309_s1 + $0x1] sm:$0x1]  ;;  %v35_v6 = vld [vmem:[%s310_s2] sm:$0x1]  ;;  %v34_v10 = vld [vmem:[%s309_s1 + $0x2] sm:$0x1] }
  0x15   :  { %v42_v2 = vshrl.u32 %v41_v0, 7  ;;  %v32_v9 = vld [vmem:[%s309_s1] sm:$0x1]  ;;  %v37_v11 = vld [vmem:[%s310_s2 + $0x2] sm:$0x1]  ;;  %v102_v14 = vsub.f32 %v36_v4, %v33_v5  ;;  %v31_v32 = vld [vmem:[#allocation2 + $0x10] sm:$0xff] }
  0x16   :  { %v101_v12 = vsub.f32 %v35_v6, %v32_v9  ;;  %v103_v13 = vsub.f32 %v37_v11, %v34_v10  ;;  %v29_v26 = vld [vmem:[#allocation2] sm:$0xff]  ;;  %vm153_vm0 = vcmask 64512   ;;  %s239_s1 = smov [#allocation5]  }
  0x17   :  { %v43_v3 = vsub.s32 0, %v42_v2  ;;  %s162_s2 = sshll.u32 %s239_s1, 4  ;;  %s163_s2 = int_to_ptr.vmem [resolvable:$true] %s162_s2 }
  0x18   :  { %s209_s10 = scalar_lea.vmem %s163_s2, 384  ;;  %p214_p9 = scmp.lt.s32.totalorder %s163_s2, %s163_s2 }
  0x19   :  { %v48_v7 = vrot.slane %v36_v4, %v43_v3  ;;  %v44_v8 = vrot.slane %v35_v6, %v43_v3  ;;  %v118_v15 = vrot.slane %v103_v13, %v43_v3  ;;  %v110_v16 = vrot.slane %v101_v12, %v43_v3  ;;  %p210_p8 = scmp.ne.s32.totalorder %s163_s2, %s209_s10  ;;  %p215_p10 = scmp.lt.s32.totalorder %s209_s10, %s209_s10 }
  0x1a   :  { %v52_v17 = vrot.slane %v37_v11, %v43_v3  ;;  %v114_v18 = vrot.slane %v102_v14, %v43_v3  ;;  %v78_v19 = vrot.slane %v33_v5, %v43_v3  ;;  %v74_v20 = vrot.slane %v32_v9, %v43_v3 }
  0x1b   :  { %58 = vperm.xlu0 %180, %v48_v7   ;;  %54 = vperm.xlu1 %179, %v44_v8   ;;  %v82_v21 = vrot.slane %v34_v10, %v43_v3  ;;  %p216_p11 = por %p215_p10, %p214_p9 }
  0x1d   :  { %p217_p12 = pnand %p216_p11, %p210_p8 }
  0x1f   :  { %128 = vperm.xlu1 %179, %v118_v15   ;;  %120 = vperm.xlu0 %180, %v110_v16  }
  0x23   :  { %62 = vperm.xlu1 %179, %v52_v17   ;;  %124 = vperm.xlu0 %180, %v114_v18  }
  0x27   :  { %88 = vperm.xlu1 %179, %v78_v19   ;;  %84 = vperm.xlu0 %180, %v74_v20  }
  0x2b   :  { %92 = vperm.xlu0 %180, %v82_v21  }
  0x9a   :  { %v59_v22 = vpop.permute.xlu0 %58  ;;  %v55_v23 = vpop.permute.xlu1 %54 }
  0x9b   :  { %v65_v30 = vmin.f32 %v29_v26, %v55_v23  ;;  %v66_v31 = vmin.f32 %v30_v29, %v59_v22 }
  0x9e   :  { %v129_v24 = vpop.permute.xlu1 %128  ;;  %v121_v25 = vpop.permute.xlu0 %120 }
  0x9f   :  { %181 = vrcp.f32 %v121_v25 }
  0xa2   :  { %v63_v27 = vpop.permute.xlu1 %62  ;;  %v125_v28 = vpop.permute.xlu0 %124 }
  0xa3   :  { %183 = vrcp.f32 %v125_v28  ;;  %v67_v37 = vmin.f32 %v31_v32, %v63_v27 }
  0xa4   :  { %185 = vrcp.f32 %v129_v24 }
  0xa6   :  { %v89_v33 = vpop.permute.xlu1 %88  ;;  %v85_v34 = vpop.permute.xlu0 %84 }
  0xa7   :  { %v95_v35 = vmax.f32 %v65_v30, %v85_v34  ;;  %v96_v36 = vmax.f32 %v66_v31, %v89_v33 }
  0xa9   :  { %v98_v38 = vsub.f32 %v95_v35, %v85_v34  ;;  %v182_v39 = vpop.eup %181  ;;  %v99_v43 = vsub.f32 %v96_v36, %v89_v33 }
  0xaa   :  { %v93_v40 = vpop.permute.xlu0 %92 }
  0xab   :  { %v132_v41 = vmul.f32 %v182_v39, %v98_v38  ;;  %v97_v42 = vmax.f32 %v67_v37, %v93_v40 }
  0xad   :  { %v184_v44 = vpop.eup %183  ;;  %v137_v45 = vmul.f32 255.0, %v132_v41  ;;  %v100_v46 = vsub.f32 %v97_v42, %v93_v40 }
  0xae   :  { %v186_v47 = vpop.eup %185  ;;  %v134_v48 = vmul.f32 %v184_v44, %v99_v43 }
  0xaf   :  { %v140_v49 = vfloor.f32 %v137_v45  ;;  %v136_v50 = vmul.f32 %v186_v47, %v100_v46 }
  0xb0   :  { %v138_v51 = vmul.f32 255.0, %v134_v48 }
  0xb1   :  { %v144_v52 = vmul.f32 0.003921569, %v140_v49  ;;  %v139_v53 = vmul.f32 255.0, %v136_v50 }
  0xb2   :  { %v141_v54 = vfloor.f32 %v138_v51 }
  0xb3   :  { %v147_v55 = vmul.f32 %v144_v52, %v121_v25  ;;  %v142_v56 = vfloor.f32 %v139_v53 }
  0xb4   :  { %v145_v57 = vmul.f32 0.003921569, %v141_v54 }
  0xb5   :  { %v150_v58 = vadd.f32 %v147_v55, %v85_v34  ;;  %v146_v59 = vmul.f32 0.003921569, %v142_v56 }
  0xb6   :  { %v148_v60 = vmul.f32 %v145_v57, %v125_v28 }
  0xb7   :  { %v149_v61 = vmul.f32 %v146_v59, %v129_v24  ;;  %154 = vst.msk [vmem:[#allocation5] sm:$0xff] %vm153_vm0, %v150_v58 }
  0xb8   :  { %v151_v62 = vadd.f32 %v148_v60, %v89_v33 }
  0xb9   :  { %v152_v63 = vadd.f32 %v149_v61, %v93_v40 }
  0xba   :  { %155 = vst.msk [vmem:[#allocation5 + $0x8] sm:$0xff] %vm153_vm0, %v151_v62 }
  0xbb   :  { %156 = vst.msk [vmem:[#allocation5 + $0x10] sm:$0xff] %vm153_vm0, %v152_v63 }
  0xbc   :  { %220 = shalt.err (!%p217_p12)
}
  0xbd   :  { %s221_s13 = scalar_lea.hbm %s311_s3, 384 }
  0xbe   :  { %p222_p13 = scmp.ne.s32.totalorder %s311_s3, %s221_s13  ;;  %p225_p0 = scmp.lt.u32.totalorder %s221_s13, %s311_s3 }
  0xc0   :  { %p227_p1 = pnand %p225_p0, %p222_p13 }
  0xc2   :  { %230 = shalt.err (!%p227_p1)
}
  0xc3   :  { %168 = dma.vmem_to_hbm [thread:$0]  %s163_s2, 384, %s311_s3, [#allocation4], %s236_s22, %s236_s22, %s237_s23  }
  0xc4   :  { %233 = dma.done.wait [#allocation4], 384  }
  0xc5   :  { %234 = vsyncadd [#allocation4], 4294966912 }
  0xc6   :  { %172 = vsyncpa [#allocation3], 1 }
  0xc7   :  { %173 = vsyncpa [#allocation4], 1 }

</bundles_post_ra>
